<compile_context>
chip_gen: v5e
topology: v5e:2x2
jax: 0.10.0
libtpu: 0.0.40
codegen_flags: <defaults>
</compile_context>

<pallas_src>
import jax
import jax.numpy as jnp
from jax.experimental import pallas as pl
from jax.experimental.pallas import tpu as pltpu

B = 1
C1, C2, C3 = 32, 48, 144
L = 256
CV = C1 + C2 + C3          # 224
COUT = 2 * CV              # 448

_ELEM_BYTES = 4
_READ_BYTES = 2 * B * CV * L * _ELEM_BYTES    # each input read twice (HBM->HBM x2)
_WRITE_BYTES = B * COUT * L * _ELEM_BYTES


def concat_kernel(x1_ref, x2_ref, x3_ref, o_ref, sem):
    # 6 independent HBM->HBM DMAs: [x1|x2|x3] written to out[:, 0:224] and
    # again to out[:, 224:448]. Start all, then wait all (no read/write barrier).
    srcs = (x1_ref, x2_ref, x3_ref)
    offs = (0, C1, C1 + C2)
    sizes = (C1, C2, C3)

    copies = []
    i = 0
    for half in (0, CV):
        for src, off, sz in zip(srcs, offs, sizes):
            dst = o_ref.at[:, half + off:half + off + sz, :]
            cp = pltpu.make_async_copy(src, dst, sem.at[i])
            cp.start()
            copies.append(cp)
            i += 1

    for cp in copies:
        cp.wait()


def model_forward(x1, x2, x3):
    return pl.pallas_call(
        concat_kernel,
        out_shape=jax.ShapeDtypeStruct((B, COUT, L), x1.dtype),
        in_specs=[
            pl.BlockSpec(memory_space=pl.ANY),
            pl.BlockSpec(memory_space=pl.ANY),
            pl.BlockSpec(memory_space=pl.ANY),
        ],
        out_specs=pl.BlockSpec(memory_space=pl.ANY),
        scratch_shapes=[
            pltpu.SemaphoreType.DMA((6,)),
        ],
        cost_estimate=pl.CostEstimate(
            flops=0,
            transcendentals=0,
            bytes_accessed=_READ_BYTES + _WRITE_BYTES,
        ),
    )(x1, x2, x3)


def model_forward_ref(x1, x2, x3):
    v = jnp.concatenate([x1, x2, x3], axis=1)
    v1 = v[:, 0:]           # slice 0:2**64-1 clamps to full extent
    v2 = v1[:, 0:256]       # clamps to 224 rows -> == v
    return jnp.concatenate((v, v2), axis=1)


if __name__ == "__main__":
    key = jax.random.PRNGKey(0)
    k1, k2, k3 = jax.random.split(key, 3)
    x1 = jax.random.normal(k1, (B, C1, L), dtype=jnp.float32)
    x2 = jax.random.normal(k2, (B, C2, L), dtype=jnp.float32)
    x3 = jax.random.normal(k3, (B, C3, L), dtype=jnp.float32)

    y = model_forward(x1, x2, x3)
    jax.block_until_ready(y)

    y_ref = model_forward_ref(x1, x2, x3)
    assert y.shape == (B, COUT, L), y.shape
    assert jnp.array_equal(y, y_ref), "mismatch vs reference"

    print("KERNEL_OK")
</pallas_src>

<mosaic_0001>
module attributes {stable_mosaic.version = 11 : i64} {
  func.func @concat_kernel(%arg0: memref<1x32x256xf32, #tpu.memory_space<any>>, %arg1: memref<1x48x256xf32, #tpu.memory_space<any>>, %arg2: memref<1x144x256xf32, #tpu.memory_space<any>>, %arg3: memref<1x448x256xf32, #tpu.memory_space<any>>, %arg4: memref<6x!tpu.dma_semaphore, #tpu.memory_space<semaphore_mem>>) attributes {dimension_semantics = [], scalar_prefetch = 0 : i64, scratch_operands = 1 : i64, tpu.core_type = #tpu.core_type<tc>} {
    %c0_i32 = arith.constant 0 : i32
    %c0_i32_0 = arith.constant 0 : i32
    %c0_i32_1 = arith.constant 0 : i32
    %c0_i32_2 = arith.constant 0 : i32
    %0 = tpu.memref_slice %arg3[%c0_i32_0, %c0_i32_1, %c0_i32_2] : memref<1x448x256xf32, #tpu.memory_space<any>> -> memref<1x32x256xf32, #tpu.memory_space<any>>
    %1 = tpu.memref_slice %arg4[%c0_i32] : memref<6x!tpu.dma_semaphore, #tpu.memory_space<semaphore_mem>> -> memref<1x!tpu.dma_semaphore, #tpu.memory_space<semaphore_mem>>
    %2 = tpu.memref_squeeze %1 : memref<1x!tpu.dma_semaphore, #tpu.memory_space<semaphore_mem>> -> memref<!tpu.dma_semaphore, #tpu.memory_space<semaphore_mem>>
    tpu.enqueue_dma source(%arg0 : memref<1x32x256xf32, #tpu.memory_space<any>>) target(%0 : memref<1x32x256xf32, #tpu.memory_space<any>>) target_semaphore(%2 : memref<!tpu.dma_semaphore, #tpu.memory_space<semaphore_mem>>)
    %c1_i32 = arith.constant 1 : i32
    %c0_i32_3 = arith.constant 0 : i32
    %c32_i32 = arith.constant 32 : i32
    %c0_i32_4 = arith.constant 0 : i32
    %3 = tpu.memref_slice %arg3[%c0_i32_3, %c32_i32, %c0_i32_4] : memref<1x448x256xf32, #tpu.memory_space<any>> -> memref<1x48x256xf32, #tpu.memory_space<any>>
    %4 = tpu.memref_slice %arg4[%c1_i32] : memref<6x!tpu.dma_semaphore, #tpu.memory_space<semaphore_mem>> -> memref<1x!tpu.dma_semaphore, #tpu.memory_space<semaphore_mem>>
    %5 = tpu.memref_squeeze %4 : memref<1x!tpu.dma_semaphore, #tpu.memory_space<semaphore_mem>> -> memref<!tpu.dma_semaphore, #tpu.memory_space<semaphore_mem>>
    tpu.enqueue_dma source(%arg1 : memref<1x48x256xf32, #tpu.memory_space<any>>) target(%3 : memref<1x48x256xf32, #tpu.memory_space<any>>) target_semaphore(%5 : memref<!tpu.dma_semaphore, #tpu.memory_space<semaphore_mem>>)
    %c2_i32 = arith.constant 2 : i32
    %c0_i32_5 = arith.constant 0 : i32
    %c80_i32 = arith.constant 80 : i32
    %c0_i32_6 = arith.constant 0 : i32
    %6 = tpu.memref_slice %arg3[%c0_i32_5, %c80_i32, %c0_i32_6] : memref<1x448x256xf32, #tpu.memory_space<any>> -> memref<1x144x256xf32, #tpu.memory_space<any>>
    %7 = tpu.memref_slice %arg4[%c2_i32] : memref<6x!tpu.dma_semaphore, #tpu.memory_space<semaphore_mem>> -> memref<1x!tpu.dma_semaphore, #tpu.memory_space<semaphore_mem>>
    %8 = tpu.memref_squeeze %7 : memref<1x!tpu.dma_semaphore, #tpu.memory_space<semaphore_mem>> -> memref<!tpu.dma_semaphore, #tpu.memory_space<semaphore_mem>>
    tpu.enqueue_dma source(%arg2 : memref<1x144x256xf32, #tpu.memory_space<any>>) target(%6 : memref<1x144x256xf32, #tpu.memory_space<any>>) target_semaphore(%8 : memref<!tpu.dma_semaphore, #tpu.memory_space<semaphore_mem>>)
    %c3_i32 = arith.constant 3 : i32
    %c0_i32_7 = arith.constant 0 : i32
    %c224_i32 = arith.constant 224 : i32
    %c0_i32_8 = arith.constant 0 : i32
    %9 = tpu.memref_slice %arg3[%c0_i32_7, %c224_i32, %c0_i32_8] : memref<1x448x256xf32, #tpu.memory_space<any>> -> memref<1x32x256xf32, #tpu.memory_space<any>>
    %10 = tpu.memref_slice %arg4[%c3_i32] : memref<6x!tpu.dma_semaphore, #tpu.memory_space<semaphore_mem>> -> memref<1x!tpu.dma_semaphore, #tpu.memory_space<semaphore_mem>>
    %11 = tpu.memref_squeeze %10 : memref<1x!tpu.dma_semaphore, #tpu.memory_space<semaphore_mem>> -> memref<!tpu.dma_semaphore, #tpu.memory_space<semaphore_mem>>
    tpu.enqueue_dma source(%arg0 : memref<1x32x256xf32, #tpu.memory_space<any>>) target(%9 : memref<1x32x256xf32, #tpu.memory_space<any>>) target_semaphore(%11 : memref<!tpu.dma_semaphore, #tpu.memory_space<semaphore_mem>>)
    %c4_i32 = arith.constant 4 : i32
    %c0_i32_9 = arith.constant 0 : i32
    %c256_i32 = arith.constant 256 : i32
    %c0_i32_10 = arith.constant 0 : i32
    %12 = tpu.memref_slice %arg3[%c0_i32_9, %c256_i32, %c0_i32_10] : memref<1x448x256xf32, #tpu.memory_space<any>> -> memref<1x48x256xf32, #tpu.memory_space<any>>
    %13 = tpu.memref_slice %arg4[%c4_i32] : memref<6x!tpu.dma_semaphore, #tpu.memory_space<semaphore_mem>> -> memref<1x!tpu.dma_semaphore, #tpu.memory_space<semaphore_mem>>
    %14 = tpu.memref_squeeze %13 : memref<1x!tpu.dma_semaphore, #tpu.memory_space<semaphore_mem>> -> memref<!tpu.dma_semaphore, #tpu.memory_space<semaphore_mem>>
    tpu.enqueue_dma source(%arg1 : memref<1x48x256xf32, #tpu.memory_space<any>>) target(%12 : memref<1x48x256xf32, #tpu.memory_space<any>>) target_semaphore(%14 : memref<!tpu.dma_semaphore, #tpu.memory_space<semaphore_mem>>)
    %c5_i32 = arith.constant 5 : i32
    %c0_i32_11 = arith.constant 0 : i32
    %c304_i32 = arith.constant 304 : i32
    %c0_i32_12 = arith.constant 0 : i32
    %15 = tpu.memref_slice %arg3[%c0_i32_11, %c304_i32, %c0_i32_12] : memref<1x448x256xf32, #tpu.memory_space<any>> -> memref<1x144x256xf32, #tpu.memory_space<any>>
    %16 = tpu.memref_slice %arg4[%c5_i32] : memref<6x!tpu.dma_semaphore, #tpu.memory_space<semaphore_mem>> -> memref<1x!tpu.dma_semaphore, #tpu.memory_space<semaphore_mem>>
    %17 = tpu.memref_squeeze %16 : memref<1x!tpu.dma_semaphore, #tpu.memory_space<semaphore_mem>> -> memref<!tpu.dma_semaphore, #tpu.memory_space<semaphore_mem>>
    tpu.enqueue_dma source(%arg2 : memref<1x144x256xf32, #tpu.memory_space<any>>) target(%15 : memref<1x144x256xf32, #tpu.memory_space<any>>) target_semaphore(%17 : memref<!tpu.dma_semaphore, #tpu.memory_space<semaphore_mem>>)
    %c0_i32_13 = arith.constant 0 : i32
    %c0_i32_14 = arith.constant 0 : i32
    %c0_i32_15 = arith.constant 0 : i32
    %c0_i32_16 = arith.constant 0 : i32
    %18 = tpu.memref_slice %arg3[%c0_i32_14, %c0_i32_15, %c0_i32_16] : memref<1x448x256xf32, #tpu.memory_space<any>> -> memref<1x32x256xf32, #tpu.memory_space<any>>
    %19 = tpu.memref_slice %arg4[%c0_i32_13] : memref<6x!tpu.dma_semaphore, #tpu.memory_space<semaphore_mem>> -> memref<1x!tpu.dma_semaphore, #tpu.memory_space<semaphore_mem>>
    %20 = tpu.memref_squeeze %19 : memref<1x!tpu.dma_semaphore, #tpu.memory_space<semaphore_mem>> -> memref<!tpu.dma_semaphore, #tpu.memory_space<semaphore_mem>>
    tpu.wait_dma2 semaphore(%20 : memref<!tpu.dma_semaphore, #tpu.memory_space<semaphore_mem>>) src(%arg0 : memref<1x32x256xf32, #tpu.memory_space<any>>) dst(%18 : memref<1x32x256xf32, #tpu.memory_space<any>>)
    %c1_i32_17 = arith.constant 1 : i32
    %c0_i32_18 = arith.constant 0 : i32
    %c32_i32_19 = arith.constant 32 : i32
    %c0_i32_20 = arith.constant 0 : i32
    %21 = tpu.memref_slice %arg3[%c0_i32_18, %c32_i32_19, %c0_i32_20] : memref<1x448x256xf32, #tpu.memory_space<any>> -> memref<1x48x256xf32, #tpu.memory_space<any>>
    %22 = tpu.memref_slice %arg4[%c1_i32_17] : memref<6x!tpu.dma_semaphore, #tpu.memory_space<semaphore_mem>> -> memref<1x!tpu.dma_semaphore, #tpu.memory_space<semaphore_mem>>
    %23 = tpu.memref_squeeze %22 : memref<1x!tpu.dma_semaphore, #tpu.memory_space<semaphore_mem>> -> memref<!tpu.dma_semaphore, #tpu.memory_space<semaphore_mem>>
    tpu.wait_dma2 semaphore(%23 : memref<!tpu.dma_semaphore, #tpu.memory_space<semaphore_mem>>) src(%arg1 : memref<1x48x256xf32, #tpu.memory_space<any>>) dst(%21 : memref<1x48x256xf32, #tpu.memory_space<any>>)
    %c2_i32_21 = arith.constant 2 : i32
    %c0_i32_22 = arith.constant 0 : i32
    %c80_i32_23 = arith.constant 80 : i32
    %c0_i32_24 = arith.constant 0 : i32
    %24 = tpu.memref_slice %arg3[%c0_i32_22, %c80_i32_23, %c0_i32_24] : memref<1x448x256xf32, #tpu.memory_space<any>> -> memref<1x144x256xf32, #tpu.memory_space<any>>
    %25 = tpu.memref_slice %arg4[%c2_i32_21] : memref<6x!tpu.dma_semaphore, #tpu.memory_space<semaphore_mem>> -> memref<1x!tpu.dma_semaphore, #tpu.memory_space<semaphore_mem>>
    %26 = tpu.memref_squeeze %25 : memref<1x!tpu.dma_semaphore, #tpu.memory_space<semaphore_mem>> -> memref<!tpu.dma_semaphore, #tpu.memory_space<semaphore_mem>>
    tpu.wait_dma2 semaphore(%26 : memref<!tpu.dma_semaphore, #tpu.memory_space<semaphore_mem>>) src(%arg2 : memref<1x144x256xf32, #tpu.memory_space<any>>) dst(%24 : memref<1x144x256xf32, #tpu.memory_space<any>>)
    %c3_i32_25 = arith.constant 3 : i32
    %c0_i32_26 = arith.constant 0 : i32
    %c224_i32_27 = arith.constant 224 : i32
    %c0_i32_28 = arith.constant 0 : i32
    %27 = tpu.memref_slice %arg3[%c0_i32_26, %c224_i32_27, %c0_i32_28] : memref<1x448x256xf32, #tpu.memory_space<any>> -> memref<1x32x256xf32, #tpu.memory_space<any>>
    %28 = tpu.memref_slice %arg4[%c3_i32_25] : memref<6x!tpu.dma_semaphore, #tpu.memory_space<semaphore_mem>> -> memref<1x!tpu.dma_semaphore, #tpu.memory_space<semaphore_mem>>
    %29 = tpu.memref_squeeze %28 : memref<1x!tpu.dma_semaphore, #tpu.memory_space<semaphore_mem>> -> memref<!tpu.dma_semaphore, #tpu.memory_space<semaphore_mem>>
    tpu.wait_dma2 semaphore(%29 : memref<!tpu.dma_semaphore, #tpu.memory_space<semaphore_mem>>) src(%arg0 : memref<1x32x256xf32, #tpu.memory_space<any>>) dst(%27 : memref<1x32x256xf32, #tpu.memory_space<any>>)
    %c4_i32_29 = arith.constant 4 : i32
    %c0_i32_30 = arith.constant 0 : i32
    %c256_i32_31 = arith.constant 256 : i32
    %c0_i32_32 = arith.constant 0 : i32
    %30 = tpu.memref_slice %arg3[%c0_i32_30, %c256_i32_31, %c0_i32_32] : memref<1x448x256xf32, #tpu.memory_space<any>> -> memref<1x48x256xf32, #tpu.memory_space<any>>
    %31 = tpu.memref_slice %arg4[%c4_i32_29] : memref<6x!tpu.dma_semaphore, #tpu.memory_space<semaphore_mem>> -> memref<1x!tpu.dma_semaphore, #tpu.memory_space<semaphore_mem>>
    %32 = tpu.memref_squeeze %31 : memref<1x!tpu.dma_semaphore, #tpu.memory_space<semaphore_mem>> -> memref<!tpu.dma_semaphore, #tpu.memory_space<semaphore_mem>>
    tpu.wait_dma2 semaphore(%32 : memref<!tpu.dma_semaphore, #tpu.memory_space<semaphore_mem>>) src(%arg1 : memref<1x48x256xf32, #tpu.memory_space<any>>) dst(%30 : memref<1x48x256xf32, #tpu.memory_space<any>>)
    %c5_i32_33 = arith.constant 5 : i32
    %c0_i32_34 = arith.constant 0 : i32
    %c304_i32_35 = arith.constant 304 : i32
    %c0_i32_36 = arith.constant 0 : i32
    %33 = tpu.memref_slice %arg3[%c0_i32_34, %c304_i32_35, %c0_i32_36] : memref<1x448x256xf32, #tpu.memory_space<any>> -> memref<1x144x256xf32, #tpu.memory_space<any>>
    %34 = tpu.memref_slice %arg4[%c5_i32_33] : memref<6x!tpu.dma_semaphore, #tpu.memory_space<semaphore_mem>> -> memref<1x!tpu.dma_semaphore, #tpu.memory_space<semaphore_mem>>
    %35 = tpu.memref_squeeze %34 : memref<1x!tpu.dma_semaphore, #tpu.memory_space<semaphore_mem>> -> memref<!tpu.dma_semaphore, #tpu.memory_space<semaphore_mem>>
    tpu.wait_dma2 semaphore(%35 : memref<!tpu.dma_semaphore, #tpu.memory_space<semaphore_mem>>) src(%arg2 : memref<1x144x256xf32, #tpu.memory_space<any>>) dst(%33 : memref<1x144x256xf32, #tpu.memory_space<any>>)
    return
  }
}

</mosaic_0001>

<bundles_post_ra>
// kernel: tpu_custom_call.1
= control target key start
LH: loop header
LB: loop body
LE: loop exit
PB: predicated region body
PF: predicated region fallthrough
CT: control target
= control target key end

     0   :  { %s175_s21 = smov [#allocation2]   ;;  %s176_s22 = smov [#allocation3]   ;;  %s249_s0 = inlined_call_operand.hbm [shape: f32[1,32,256], index: 0, kind: input, shape index: {}]   ;;  %s250_s3 = inlined_call_operand.hbm [shape: f32[1,448,256], index: 3, kind: output, shape index: {}]   ;;  %s251_s1 = inlined_call_operand.hbm [shape: f32[1,48,256], index: 1, kind: input, shape index: {}]   ;;  %s252_s2 = inlined_call_operand.hbm [shape: f32[1,144,256], index: 2, kind: input, shape index: {}]  }
   0x1   :  { %s12_s14 = sshll.u32 %s249_s0, 4  ;;  %s14_s17 = sshll.u32 %s250_s3, 4  ;;  %s214_s14 = int_to_ptr.hbm [resolvable:$true] %s12_s14  ;;  %s15_s17 = int_to_ptr.hbm [resolvable:$true] %s14_s17 }
   0x2   :  { %s19_s20 = scalar_lea.hbm %s250_s3, 64  ;;  %s177_s23 = smov 0  }
   0x3   :  { %18 = dma.general %s214_s14, 1024, %s15_s17, %s175_s21, %s176_s22, [#allocation4], %s177_s23, 0  }
   0x4   :  { %s25_s0 = sshll.u32 %s251_s1, 4  ;;  %s27_s26 = sshll.u32 %s19_s20, 4  ;;  %s224_s0 = int_to_ptr.hbm [resolvable:$true] %s25_s0  ;;  %s28_s26 = int_to_ptr.hbm [resolvable:$true] %s27_s26 }
   0x5   :  { %s178_s27 = smov [#allocation2 + $0x1]   ;;  %s179_s28 = smov [#allocation5]  }
   0x6   :  { %31 = dma.general %s224_s0, 1536, %s28_s26, %s178_s27, %s179_s28, [#allocation6], %s177_s23, 0  }
   0x7   :  { %s32_s4 = scalar_lea.hbm %s250_s3, 160  ;;  %s38_s7 = sshll.u32 %s252_s2, 4  ;;  %s39_s7 = int_to_ptr.hbm [resolvable:$true] %s38_s7 }
   0x8   :  { %s40_s1 = sshll.u32 %s32_s4, 4  ;;  %s45_s10 = scalar_lea.hbm %s250_s3, 448  ;;  %s41_s1 = int_to_ptr.hbm [resolvable:$true] %s40_s1 }
   0x9   :  { %s180_s11 = smov [#allocation2 + $0x2]   ;;  %s181_s12 = smov [#allocation7]  }
   0xa   :  { %44 = dma.general %s39_s7, 4608, %s41_s1, %s180_s11, %s181_s12, [#allocation8], %s177_s23, 0  }
   0xb   :  { %s53_s13 = sshll.u32 %s45_s10, 4  ;;  %s182_s15 = smov [#allocation2 + $0x3]   ;;  %s54_s13 = int_to_ptr.hbm [resolvable:$true] %s53_s13 }
   0xc   :  { %s183_s16 = smov [#allocation9]   ;;  %s58_s18 = scalar_lea.hbm %s250_s3, 512 }
   0xd   :  { %57 = dma.general %s214_s14, 1024, %s54_s13, %s182_s15, %s183_s16, [#allocation10], %s177_s23, 0  }
   0xe   :  { %s66_s19 = sshll.u32 %s58_s18, 4  ;;  %s71_s22 = scalar_lea.hbm %s250_s3, 608  ;;  %s67_s19 = int_to_ptr.hbm [resolvable:$true] %s66_s19 }
   0xf   :  { %s184_s24 = smov [#allocation2 + $0x4]   ;;  %s185_s25 = smov [#allocation11]  }
  0x10   :  { %70 = dma.general %s224_s0, 1536, %s67_s19, %s184_s24, %s185_s25, [#allocation12], %s177_s23, 0  }
  0x11   :  { %s79_s26 = sshll.u32 %s71_s22, 4  ;;  %s186_s27 = smov [#allocation2 + $0x5]   ;;  %s80_s26 = int_to_ptr.hbm [resolvable:$true] %s79_s26 }
  0x12   :  { %s187_s28 = smov [#allocation13]  }
  0x13   :  { %83 = dma.general %s39_s7, 4608, %s80_s26, %s186_s27, %s187_s28, [#allocation14], %s177_s23, 0  }
  0x14   :  { %163 = dma.done.wait [#allocation2], 1024 }
  0x15   :  { %164 = vsyncadd [#allocation2], 4294966272 }
  0x16   :  { %165 = dma.done.wait [#allocation2 + $0x1], 1536 }
  0x17   :  { %166 = vsyncadd [#allocation2 + $0x1], 4294965760 }
  0x18   :  { %167 = dma.done.wait [#allocation2 + $0x2], 4608 }
  0x19   :  { %168 = vsyncadd [#allocation2 + $0x2], 4294962688 }
  0x1a   :  { %169 = dma.done.wait [#allocation2 + $0x3], 1024 }
  0x1b   :  { %170 = vsyncadd [#allocation2 + $0x3], 4294966272 }
  0x1c   :  { %171 = dma.done.wait [#allocation2 + $0x4], 1536 }
  0x1d   :  { %172 = vsyncadd [#allocation2 + $0x4], 4294965760 }
  0x1e   :  { %173 = dma.done.wait [#allocation2 + $0x5], 4608 }
  0x1f   :  { %174 = vsyncadd [#allocation2 + $0x5], 4294962688 }
  0x20   :  { %103 = vsyncmov [#allocation2] }
  0x23   :  { %s104_s3 = vpop.sfrf %103 }
  0x24   :  { %p144_p0 = scmp.ne.s32.totalorder %s104_s3, 0 }
  0x26   :  { %108 = shalt.err (%p144_p0)  }
  0x27   :  { %110 = vsyncmov [#allocation2 + $0x1] }
  0x2a   :  { %s111_s14 = vpop.sfrf %110 }
  0x2b   :  { %p145_p1 = scmp.ne.s32.totalorder %s111_s14, 0 }
  0x2d   :  { %115 = shalt.err (%p145_p1)  }
  0x2e   :  { %117 = vsyncmov [#allocation2 + $0x2] }
  0x31   :  { %s118_s23 = vpop.sfrf %117 }
  0x32   :  { %p146_p2 = scmp.ne.s32.totalorder %s118_s23, 0 }
  0x34   :  { %122 = shalt.err (%p146_p2)  }
  0x35   :  { %124 = vsyncmov [#allocation2 + $0x3] }
  0x38   :  { %s125_s0 = vpop.sfrf %124 }
  0x39   :  { %p147_p3 = scmp.ne.s32.totalorder %s125_s0, 0 }
  0x3b   :  { %129 = shalt.err (%p147_p3)  }
  0x3c   :  { %131 = vsyncmov [#allocation2 + $0x4] }
  0x3f   :  { %s132_s29 = vpop.sfrf %131 }
  0x40   :  { %p148_p4 = scmp.ne.s32.totalorder %s132_s29, 0 }
  0x42   :  { %136 = shalt.err (%p148_p4)  }
  0x43   :  { %138 = vsyncmov [#allocation2 + $0x5] }
  0x46   :  { %s139_s30 = vpop.sfrf %138 }
  0x47   :  { %p149_p5 = scmp.ne.s32.totalorder %s139_s30, 0 }
  0x49   :  { %143 = shalt.err (%p149_p5)  }

</bundles_post_ra>
